<compile_context>
chip_gen: v7x
topology: tpu7x:2x2x1
jax: 0.10.0
libtpu: 0.0.40
codegen_flags: <defaults>
</compile_context>

<pallas_src>
import functools

import jax
import jax.numpy as jnp
from jax.experimental import pallas as pl
from jax.experimental.pallas import tpu as pltpu

EPS = 1e-6

# Scoped-VMEM request: fine on every generation (v5e/v6e: 128 MiB physical,
# v7x: 64 MiB physical per TensorCore).
_VMEM_LIMIT_BYTES = 32 * 1024 * 1024
# Budget for double-buffered (in + out) tiles + f32 compute temporaries.
_TILE_BUDGET_BYTES = 16 * 1024 * 1024
_MAX_TILE_ROWS = 1024


def _layernorm_kernel(alpha_ref, bias_ref, x_ref, o_ref, *, approx):
    # x_ref: (TILE_ROWS, D) block in VMEM; alpha/bias: (1,) scalars in SMEM.
    x = x_ref[...].astype(jnp.float32)  # keep all math in f32 (v5e VPU has no bf16)
    d = x.shape[-1]

    # Single-pass sum / sum-of-squares.
    s1 = jnp.sum(x, axis=-1, keepdims=True)
    s2 = jnp.sum(x * x, axis=-1, keepdims=True)
    mean = s1 * jnp.float32(1.0 / d)
    # torch.std is unbiased (divides by N-1); clamp tiny negative cancellation.
    var = jnp.maximum((s2 - s1 * mean) * jnp.float32(1.0 / (d - 1)), 0.0)
    std = jnp.sqrt(var)

    # Fold alpha into the per-row scale; approximate reciprocal uses the EUP
    # slot (effectively free in this memory-bound kernel).
    denom = std + jnp.float32(EPS)
    if approx:
        inv = pl.reciprocal(denom, approx=True)
    else:
        inv = 1.0 / denom
    scale = alpha_ref[0] * inv                      # (TILE_ROWS, 1)
    y = (x - mean) * scale + bias_ref[0]
    o_ref[...] = y.astype(o_ref.dtype)


def _pick_tile_rows(rows, d, itemsize):
    """Largest row tile whose double-buffered IO + f32 temps fit the budget."""
    per_row_io = 2 * d * (itemsize + itemsize)      # 2x double-buffer * (in+out)
    per_row_tmp = 2 * d * 4                         # f32 upcast + diff temporaries
    target = _TILE_BUDGET_BYTES // max(per_row_io + per_row_tmp, 1)
    target = max(8, min(_MAX_TILE_ROWS, int(target)))
    if target >= rows:
        return rows
    # Keep sublane-aligned tiles (f32 packs 8 rows per vreg, bf16 packs 16).
    pack = 16 if itemsize < 4 else 8
    return max(pack, (target // pack) * pack)


def encoder_forward(x, mask, alpha, bias, *, tile_rows=None, approx_reciprocal=True):
    """Encoder forward: (identity layer stack) + LayerNormalization via Pallas.

    x:    (B, S, D) array
    mask: unused by the norm (consumed by the abstract layer stack)
    alpha, bias: shape (1,) scalar LayerNorm parameters
    """
    del mask  # consumed only by the (identity) layer stack
    B, S, D = x.shape
    assert D >= 2, "unbiased std (N-1) requires d_model >= 2"
    rows = B * S
    x2 = x.reshape(rows, D)

    if tile_rows is None:
        tile_rows = _pick_tile_rows(rows, D, jnp.dtype(x.dtype).itemsize)
    tile_rows = min(tile_rows, rows)

    # Rows are independent, so a ragged last block is safe: padded rows only
    # affect themselves and their stores are discarded by Pallas.
    grid = (pl.cdiv(rows, tile_rows),)

    kernel = functools.partial(_layernorm_kernel, approx=approx_reciprocal)

    out2 = pl.pallas_call(
        kernel,
        out_shape=jax.ShapeDtypeStruct((rows, D), x.dtype),
        grid_spec=pl.GridSpec(
            grid=grid,
            in_specs=[
                pl.BlockSpec(memory_space=pltpu.SMEM),            # alpha
                pl.BlockSpec(memory_space=pltpu.SMEM),            # bias
                pl.BlockSpec((tile_rows, D), lambda i: (i, 0)),   # x tile
            ],
            out_specs=pl.BlockSpec((tile_rows, D), lambda i: (i, 0)),
        ),
        compiler_params=pltpu.CompilerParams(
            dimension_semantics=("parallel",),   # shards rows across v7x's 2 TCs
            vmem_limit_bytes=_VMEM_LIMIT_BYTES,
        ),
    )(alpha, bias, x2)

    return out2.reshape(B, S, D)


def _reference(x, alpha, bias):
    mean = jnp.mean(x, axis=-1, keepdims=True)
    var = jnp.sum((x - mean) ** 2, axis=-1, keepdims=True) / (x.shape[-1] - 1)
    std = jnp.sqrt(var)
    return alpha[0] * (x - mean) / (std + EPS) + bias[0]


if __name__ == "__main__":
    key = jax.random.PRNGKey(0)
    kx, k2 = jax.random.split(key)

    # ---- Case 1: small, lane-dense d_model (multiple of 128 -> unmasked stores)
    B, S, D = 2, 8, 128
    x = jax.random.normal(kx, (B, S, D), dtype=jnp.float32)
    mask = jnp.ones((B, 1, S, S), dtype=jnp.float32)  # attention mask (unused by norm)

    # Deterministic parameter init matching nn.Parameter(torch.ones(1)/zeros(1)).
    alpha = jnp.ones((1,), dtype=jnp.float32)
    bias = jnp.zeros((1,), dtype=jnp.float32)

    ref = _reference(x, alpha, bias)

    # Exact-reciprocal path: tight match to the torch formula.
    out_exact = jax.block_until_ready(
        encoder_forward(x, mask, alpha, bias, approx_reciprocal=False))
    assert out_exact.shape == (B, S, D)
    assert jnp.allclose(out_exact, ref, atol=1e-5, rtol=1e-5), "mismatch (exact)"

    # Default fast path (EUP approximate reciprocal): ~1e-3-level agreement.
    out = jax.block_until_ready(encoder_forward(x, mask, alpha, bias))
    assert out.shape == (B, S, D)
    assert jnp.allclose(out, ref, atol=5e-3, rtol=5e-3), "mismatch (approx)"

    # ---- Case 2: ragged row tiling (rows not a multiple of the tile) with
    # non-trivial alpha/bias, to exercise the padded last block path.
    B2, S2, D2 = 3, 5, 256                      # rows = 15, tile_rows = 8 -> ragged
    x2 = jax.random.normal(k2, (B2, S2, D2), dtype=jnp.float32)
    mask2 = jnp.ones((B2, 1, S2, S2), dtype=jnp.float32)
    alpha2 = jnp.full((1,), 1.5, dtype=jnp.float32)
    bias2 = jnp.full((1,), -0.25, dtype=jnp.float32)
    ref2 = _reference(x2, alpha2, bias2)
    out2 = jax.block_until_ready(
        encoder_forward(x2, mask2, alpha2, bias2, tile_rows=8,
                        approx_reciprocal=False))
    assert out2.shape == (B2, S2, D2)
    assert jnp.allclose(out2, ref2, atol=1e-5, rtol=1e-5), "mismatch (ragged)"

    print("KERNEL_OK")
</pallas_src>

<mosaic_0001>
module attributes {stable_mosaic.version = 11 : i64} {
  func.func @_layernorm_kernel(%arg0: i32, %arg1: memref<1xf32, #tpu.memory_space<smem>>, %arg2: memref<1xf32, #tpu.memory_space<smem>>, %arg3: memref<16x128xf32, #tpu.memory_space<vmem>>, %arg4: memref<16x128xf32, #tpu.memory_space<vmem>>) attributes {dimension_semantics = [#tpu.dimension_semantics<parallel>], iteration_bounds = array<i64: 1>, scalar_prefetch = 0 : i64, scratch_operands = 0 : i64, tpu.core_type = #tpu.core_type<tc>, window_params = [{transform_indices = @transform_0, window_bounds = array<i64: 1>}, {transform_indices = @transform_1, window_bounds = array<i64: 1>}, {transform_indices = @transform_2, window_bounds = array<i64: 16, 128>}, {transform_indices = @transform_3, window_bounds = array<i64: 16, 128>}]} {
    %c0 = arith.constant 0 : index
    %c0_0 = arith.constant 0 : index
    %0 = vector.load %arg3[%c0, %c0_0] : memref<16x128xf32, #tpu.memory_space<vmem>>, vector<16x128xf32>
    %cst = arith.constant dense<0.000000e+00> : vector<16xf32>
    %1 = vector.multi_reduction <add>, %0, %cst [1] : vector<16x128xf32> to vector<16xf32>
    %2 = vector.shape_cast %1 : vector<16xf32> to vector<16x1xf32>
    %3 = arith.mulf %0, %0 : vector<16x128xf32>
    %cst_1 = arith.constant dense<0.000000e+00> : vector<16xf32>
    %4 = vector.multi_reduction <add>, %3, %cst_1 [1] : vector<16x128xf32> to vector<16xf32>
    %5 = vector.shape_cast %4 : vector<16xf32> to vector<16x1xf32>
    %cst_2 = arith.constant 7.812500e-03 : f32
    %6 = vector.broadcast %cst_2 : f32 to vector<16x1xf32>
    %7 = arith.mulf %2, %6 : vector<16x1xf32>
    %8 = arith.mulf %2, %7 : vector<16x1xf32>
    %9 = arith.subf %5, %8 : vector<16x1xf32>
    %cst_3 = arith.constant 0.00787401571 : f32
    %10 = vector.broadcast %cst_3 : f32 to vector<16x1xf32>
    %11 = arith.mulf %9, %10 : vector<16x1xf32>
    %cst_4 = arith.constant 0.000000e+00 : f32
    %12 = vector.broadcast %cst_4 : f32 to vector<16x1xf32>
    %13 = arith.maximumf %11, %12 : vector<16x1xf32>
    %14 = math.sqrt %13 : vector<16x1xf32>
    %cst_5 = arith.constant 9.99999997E-7 : f32
    %15 = vector.broadcast %cst_5 : f32 to vector<16x1xf32>
    %16 = arith.addf %14, %15 : vector<16x1xf32>
    %cst_6 = arith.constant 1.000000e+00 : f32
    %17 = vector.broadcast %cst_6 : f32 to vector<16x1xf32>
    %18 = arith.divf %17, %16 : vector<16x1xf32>
    %c0_7 = arith.constant 0 : index
    %19 = memref.load %arg1[%c0_7] : memref<1xf32, #tpu.memory_space<smem>>
    %20 = vector.broadcast %19 : f32 to vector<16x1xf32>
    %21 = arith.mulf %20, %18 : vector<16x1xf32>
    %22 = vector.broadcast %7 : vector<16x1xf32> to vector<16x128xf32>
    %23 = arith.subf %0, %22 : vector<16x128xf32>
    %24 = vector.broadcast %21 : vector<16x1xf32> to vector<16x128xf32>
    %25 = arith.mulf %23, %24 : vector<16x128xf32>
    %c0_8 = arith.constant 0 : index
    %26 = memref.load %arg2[%c0_8] : memref<1xf32, #tpu.memory_space<smem>>
    %27 = vector.broadcast %26 : f32 to vector<16x128xf32>
    %28 = arith.addf %25, %27 : vector<16x128xf32>
    %c0_9 = arith.constant 0 : index
    %c0_10 = arith.constant 0 : index
    %29 = vector.load %arg4[%c0_9, %c0_10] : memref<16x128xf32, #tpu.memory_space<vmem>>, vector<16x128xf32>
    tpu.vector_store %arg4[%c0_9, %c0_10], %28 {strides = array<i32>} : memref<16x128xf32, #tpu.memory_space<vmem>>, vector<16x128xf32>,
    return
  }
  func.func @transform_0(%arg0: i32) -> i32 {
    %c0_i32 = arith.constant 0 : i32
    %c0_i32_0 = arith.constant 0 : i32
    return %c0_i32 : i32
  }
  func.func @transform_1(%arg0: i32) -> i32 {
    %c0_i32 = arith.constant 0 : i32
    %c0_i32_0 = arith.constant 0 : i32
    return %c0_i32 : i32
  }
  func.func @transform_2(%arg0: i32) -> (i32, i32) {
    %c0_i32 = arith.constant 0 : i32
    %c0_i32_0 = arith.constant 0 : i32
    return %arg0, %c0_i32 : i32, i32
  }
  func.func @transform_3(%arg0: i32) -> (i32, i32) {
    %c0_i32 = arith.constant 0 : i32
    %c0_i32_0 = arith.constant 0 : i32
    return %arg0, %c0_i32 : i32, i32
  }
}

</mosaic_0001>

<bundles_post_ra>
// kernel: tpu_custom_call.1
= control target key start
LH: loop header
LB: loop body
LE: loop exit
PB: predicated region body
PF: predicated region fallthrough
CT: control target
= control target key end

     0   :  { %10 = vsyncpa [#allocation5], 0  ;;  %s224_s0 = inlined_call_operand.<no memory space> [shape: f32[1], index: 0, kind: input, shape index: {}]   ;;  %s225_s1 = inlined_call_operand.<no memory space> [shape: f32[1], index: 1, kind: input, shape index: {}]   ;;  %s226_s2 = inlined_call_operand.hbm [shape: f32[16,128], index: 2, kind: input, shape index: {}]   ;;  %s227_s3 = inlined_call_operand.hbm [shape: f32[16,128], index: 3, kind: output, shape index: {}]  }
   0x1   :  { %11 = vsyncpa [#allocation6], 0  ;;  %s164_s12 = smov [#allocation4]   ;;  %s116_s16 = scalar_lea.hbm %s226_s2, 256 }
   0x2   :  { %s21_s13 = sshll.u32 %s164_s12, 4  ;;  %p117_p0 = scmp.ne.s32.totalorder %s226_s2, %s116_s16  ;;  %s22_s13 = int_to_ptr.vmem [resolvable:$true] %s21_s13 }
   0x3   :  { %p120_p1 = scmp.lt.u32.totalorder %s116_s16, %s226_s2 }
   0x5   :  { %p122_p2 = pnand %p120_p1, %p117_p0 }
   0x7   :  { %125 = shalt.err (!%p122_p2)
}
   0x8   :  { %s126_s21 = scalar_lea.vmem %s22_s13, 256  ;;  %p131_p4 = scmp.lt.s32.totalorder %s22_s13, %s22_s13 }
   0x9   :  { %p127_p3 = scmp.ne.s32.totalorder %s22_s13, %s126_s21  ;;  %p132_p5 = scmp.lt.s32.totalorder %s126_s21, %s126_s21 }
   0xb   :  { %p133_p6 = por %p132_p5, %p131_p4 }
   0xd   :  { %p134_p7 = pnand %p133_p6, %p127_p3 }
   0xf   :  { %137 = shalt.err (!%p134_p7)
}
  0x10   :  { %s165_s22 = smov 128   ;;  %s166_s23 = smov 8  }
  0x11   :  { %27 = dma.hbm_to_vmem [thread:$0]  %s226_s2, 256, %s22_s13, [#allocation5], %s165_s22, %s165_s22, %s166_s23  }
  0x12   :  { %160 = dma.done.wait [#allocation5], 256  }
  0x13   :  { %161 = vsyncadd [#allocation5], 4294967040  ;;  %v31_v0 = vld [vmem:[#allocation4] sm:$0xff]  ;;  %v32_v2 = vld [vmem:[#allocation4 + $0x8] sm:$0xff]  ;;  %v74_v30 = vstv %s224_s0  ;;  %v82_v34 = vstv %s225_s1  ;;  %s167_s29 = smov [#allocation7]  }
  0x14   :  { %33 = vadd.xlane.f32.xlu0 %v31_v0  ;;  %v37_v1 = vmul.f32 %v31_v0, %v31_v0  ;;  %v38_v3 = vmul.f32 %v32_v2, %v32_v2  ;;  %s92_s30 = sshll.u32 %s167_s29, 4  ;;  %s93_s30 = int_to_ptr.vmem [resolvable:$true] %s92_s30 }
  0x15   :  { %s138_s0 = scalar_lea.vmem %s93_s30, 256  ;;  %p143_p9 = scmp.lt.s32.totalorder %s93_s30, %s93_s30 }
  0x16   :  { %39 = vadd.xlane.f32.xlu1 %v37_v1  ;;  %p139_p8 = scmp.ne.s32.totalorder %s93_s30, %s138_s0  ;;  %p144_p10 = scmp.lt.s32.totalorder %s138_s0, %s138_s0 }
  0x18   :  { %35 = vadd.xlane.f32.xlu0 %v32_v2  ;;  %p145_p11 = por %p144_p10, %p143_p9 }
  0x1a   :  { %41 = vadd.xlane.f32.xlu1 %v38_v3  ;;  %p146_p12 = pnand %p145_p11, %p139_p8 }
  0xa1   :  { %v34_v4 = vpop.xlane.xlu0 %33 }
  0xa2   :  { %v43_v5 = vmul.f32 0.0078125, %v34_v4 }
  0xa3   :  { %v40_v6 = vpop.xlane.xlu1 %39 }
  0xa4   :  { %v45_v7 = vmul.f32 %v43_v5, %v34_v4  ;;  %v77_v32 = vsub.f32 %v31_v0, %v43_v5 }
  0xa5   :  { %v36_v8 = vpop.xlane.xlu0 %35 }
  0xa6   :  { %v44_v9 = vmul.f32 0.0078125, %v36_v8  ;;  %v47_v10 = vsub.f32 %v40_v6, %v45_v7 }
  0xa7   :  { %v42_v11 = vpop.xlane.xlu1 %41 }
  0xa8   :  { %v46_v12 = vmul.f32 %v44_v9, %v36_v8  ;;  %v49_v13 = vmul.f32 0.007874016, %v47_v10  ;;  %v78_v38 = vsub.f32 %v32_v2, %v44_v9 }
  0xaa   :  { %v51_v14 = vmax.f32 %v49_v13, 0.0  ;;  %v48_v15 = vsub.f32 %v42_v11, %v46_v12 }
  0xac   :  { %108 = vrsqrt.f32 %v51_v14  ;;  %v50_v16 = vmul.f32 0.007874016, %v48_v15  ;;  %vm55_vm0 = vcmp.eq.f32.partialorder %v51_v14, inf  ;;  %v58_v20 = vand.u32 2147483648, %v51_v14 }
  0xad   :  { %vm57_vm1 = vcmp.eq.f32.partialorder %v51_v14, 0.0 }
  0xae   :  { %v52_v17 = vmax.f32 %v50_v16, 0.0 }
  0xb0   :  { %110 = vrsqrt.f32 %v52_v17  ;;  %vm62_vm2 = vcmp.eq.f32.partialorder %v52_v17, inf  ;;  %v65_v26 = vand.u32 2147483648, %v52_v17  ;;  %vm64_vm3 = vcmp.eq.f32.partialorder %v52_v17, 0.0 }
  0xb6   :  { %v109_v18 = vpop.eup %108 }
  0xb7   :  { %v54_v19 = vmul.f32 %v109_v18, %v51_v14 }
  0xb9   :  { %v56_v21 = vsel %vm55_vm0, %v51_v14, %v54_v19 }
  0xba   :  { %v59_v22 = vsel %vm57_vm1, %v58_v20, %v56_v21  ;;  %v111_v23 = vpop.eup %110 }
  0xbb   :  { %v67_v24 = vadd.f32 1e-06, %v59_v22  ;;  %v61_v25 = vmul.f32 %v111_v23, %v52_v17 }
  0xbd   :  { %112 = vrcp.f32 %v67_v24  ;;  %v63_v27 = vsel %vm62_vm2, %v52_v17, %v61_v25 }
  0xbe   :  { %v66_v28 = vsel %vm64_vm3, %v65_v26, %v63_v27 }
  0xbf   :  { %v68_v29 = vadd.f32 1e-06, %v66_v28 }
  0xc1   :  { %114 = vrcp.f32 %v68_v29 }
  0xc7   :  { %v113_v31 = vpop.eup %112 }
  0xc8   :  { %v75_v33 = vmul.f32 %v113_v31, %v74_v30 }
  0xca   :  { %v79_v35 = vmul.f32 %v77_v32, %v75_v33 }
  0xcb   :  { %v115_v36 = vpop.eup %114 }
  0xcc   :  { %v83_v37 = vadd.f32 %v82_v34, %v79_v35  ;;  %v76_v39 = vmul.f32 %v115_v36, %v74_v30 }
  0xce   :  { %85 = vst [vmem:[#allocation7] sm:$0xff] %v83_v37  ;;  %v80_v40 = vmul.f32 %v78_v38, %v76_v39 }
  0xd0   :  { %v84_v41 = vadd.f32 %v82_v34, %v80_v40 }
  0xd2   :  { %86 = vst [vmem:[#allocation7 + $0x8] sm:$0xff] %v84_v41 }
  0xd3   :  { %149 = shalt.err (!%p146_p12)
}
  0xd4   :  { %s150_s5 = scalar_lea.hbm %s227_s3, 256 }
  0xd5   :  { %p151_p13 = scmp.ne.s32.totalorder %s227_s3, %s150_s5  ;;  %p154_p0 = scmp.lt.u32.totalorder %s150_s5, %s227_s3 }
  0xd7   :  { %p156_p1 = pnand %p154_p0, %p151_p13 }
  0xd9   :  { %159 = shalt.err (!%p156_p1)
}
  0xda   :  { %98 = dma.vmem_to_hbm [thread:$0]  %s93_s30, 256, %s227_s3, [#allocation6], %s165_s22, %s165_s22, %s166_s23  }
  0xdb   :  { %162 = dma.done.wait [#allocation6], 256  }
  0xdc   :  { %163 = vsyncadd [#allocation6], 4294967040 }
  0xdd   :  { %102 = vsyncpa [#allocation5], 1 }
  0xde   :  { %103 = vsyncpa [#allocation6], 1 }

</bundles_post_ra>
